<compile_context>
chip_gen: v5e
topology: v5e:2x2
jax: 0.10.0
libtpu: 0.0.40
codegen_flags: <defaults>
</compile_context>

<pallas_src>
import jax
import jax.numpy as jnp
from jax.experimental import pallas as pl
from jax.experimental.pallas import tpu as pltpu


def gather_model_kernel(ids_ref, tab_ref, b_ref, o_ref):
    # ids_ref : (TM, 1)      int32  token ids for this tile
    # tab_ref : (V_pad, H)   bf16   fused (emb_table @ w), VMEM-resident
    # b_ref   : (1, H)       f32    bias, VMEM-resident
    # o_ref   : (TM, H)             output tile
    ids = ids_ref[...]                                    # (TM, 1)
    tm = ids.shape[0]
    v_pad = tab_ref.shape[0]

    # Fused gather + Linear: one-hot (TM, V_pad) @ fused (V_pad, H) on the MXU.
    # 0/1 weights select bf16 rows exactly under f32 accumulation.
    onehot = (ids == jax.lax.broadcasted_iota(jnp.int32, (tm, v_pad), 1)
              ).astype(tab_ref.dtype)                     # (TM, V_pad) bf16
    y = jnp.dot(onehot, tab_ref[...],
                preferred_element_type=jnp.float32) + b_ref[...]
    o_ref[...] = jnp.tanh(y).astype(o_ref.dtype)


def bias_tanh_kernel(x_ref, b_ref, o_ref):
    # Streamed large-vocab path: rows already gathered (fused[ids]) outside.
    # x_ref : (TM, H) bf16, b_ref : (1, H) f32, o_ref : (TM, H)
    y = x_ref[...].astype(jnp.float32) + b_ref[...]
    o_ref[...] = jnp.tanh(y).astype(o_ref.dtype)


def model_container_forward(token_ids, emb_table, w, b, *, tm=512,
                            max_resident_bytes=24 << 20,
                            out_dtype=jnp.float32):
    """ModelContainer.forward: embedding lookup -> Linear(D->H) + tanh -> (B,S,H)."""
    B, S = token_ids.shape
    V, D = emb_table.shape
    H = w.shape[1]
    N = B * S

    n_tiles = pl.cdiv(N, tm)
    n_pad = n_tiles * tm

    # task.get_embeddings prep: flatten batch token ids, pad to a tile multiple
    # (pad ids are 0, a valid vocab index; padded rows are sliced off below).
    flat_ids = token_ids.reshape(N).astype(jnp.int32)
    flat_ids = jnp.pad(flat_ids, (0, n_pad - N))

    # Fuse Embedding @ Linear weight outside the kernel: fused[v] = emb_table[v] @ w.
    fused = (emb_table.astype(jnp.float32) @ w.astype(jnp.float32)
             ).astype(jnp.bfloat16)                        # (V, H) bf16
    b2 = b.reshape(1, H).astype(jnp.float32)

    # MXU-friendly contraction dim (multiple of 256 for v6e/v7x, >=128 for v5e).
    v_pad = max(256, ((V + 255) // 256) * 256)
    resident_bytes = v_pad * H * 2                         # bf16 fused table

    if resident_bytes <= max_resident_bytes:
        # ---- Path A: VMEM-resident fused table + in-kernel one-hot MXU gather.
        fused_p = jnp.pad(fused, ((0, v_pad - V), (0, 0)))
        ids2 = flat_ids.reshape(n_pad, 1)

        vmem_limit = None
        if resident_bytes > (12 << 20):
            # v5e scoped default is 16 MiB; raise it before it bites.
            vmem_limit = min(100 << 20, resident_bytes + (32 << 20))

        out_flat = pl.pallas_call(
            gather_model_kernel,
            out_shape=jax.ShapeDtypeStruct((n_pad, H), out_dtype),
            grid_spec=pltpu.PrefetchScalarGridSpec(
                num_scalar_prefetch=0,
                grid=(n_tiles,),                 # one grid step per TM tokens
                in_specs=[
                    # token ids for this tile (double-buffered, varying index)
                    pl.BlockSpec((tm, 1), lambda i: (i, 0)),
                    # fused table: constant index -> resident, single-buffered
                    pl.BlockSpec((v_pad, H), lambda i: (0, 0),
                                 pipeline_mode=pl.Buffered(1)),
                    # bias: resident, single-buffered
                    pl.BlockSpec((1, H), lambda i: (0, 0),
                                 pipeline_mode=pl.Buffered(1)),
                ],
                out_specs=pl.BlockSpec((tm, H), lambda i: (i, 0)),
            ),
            compiler_params=pltpu.CompilerParams(
                dimension_semantics=("parallel",),   # token tiles independent
                vmem_limit_bytes=vmem_limit),
        )(ids2, fused_p, b2)
    else:
        # ---- Path B: large vocab -- gather outside (XLA), stream dense rows.
        gathered = jnp.take(fused, flat_ids, axis=0)       # (n_pad, H) bf16
        out_flat = pl.pallas_call(
            bias_tanh_kernel,
            out_shape=jax.ShapeDtypeStruct((n_pad, H), out_dtype),
            grid_spec=pltpu.PrefetchScalarGridSpec(
                num_scalar_prefetch=0,
                grid=(n_tiles,),
                in_specs=[
                    pl.BlockSpec((tm, H), lambda i: (i, 0)),
                    pl.BlockSpec((1, H), lambda i: (0, 0),
                                 pipeline_mode=pl.Buffered(1)),
                ],
                out_specs=pl.BlockSpec((tm, H), lambda i: (i, 0)),
            ),
            compiler_params=pltpu.CompilerParams(
                dimension_semantics=("parallel",)),
        )(gathered, b2)

    # task.rebuild_output equivalent: drop padding, restore (B, S, H).
    return out_flat[:N].reshape(B, S, H)


if __name__ == "__main__":
    # Small, deterministic synthetic setup (no checkpoint loading).
    B, S = 2, 8                # batch, sequence length
    V, D, H = 64, 128, 128     # vocab size, embedding dim, model hidden dim

    key = jax.random.PRNGKey(0)
    k_ids, k_tab, k_w, k_b = jax.random.split(key, 4)

    token_ids = jax.random.randint(k_ids, (B, S), 0, V, dtype=jnp.int32)
    emb_table = jax.random.normal(k_tab, (V, D), dtype=jnp.float32) * 0.02
    w = jax.random.normal(k_w, (D, H), dtype=jnp.float32) * 0.05
    b = jax.random.normal(k_b, (H,), dtype=jnp.float32) * 0.01

    # Pure-JAX f32 reference of the same forward pass (bf16 fused table inside
    # the kernel -> looser tolerance than the f32 reference).
    ref = jnp.tanh(
        jnp.take(emb_table, token_ids.reshape(-1), axis=0) @ w + b
    ).reshape(B, S, H)

    # Path A: VMEM-resident fused table + one-hot MXU gather.
    out_a = jax.block_until_ready(
        model_container_forward(token_ids, emb_table, w, b))
    assert out_a.shape == (B, S, H)
    assert jnp.allclose(out_a, ref, atol=1e-2, rtol=1e-2), \
        float(jnp.max(jnp.abs(out_a - ref)))

    # Path B: large-vocab streamed-gather fallback (forced here for coverage).
    out_b = jax.block_until_ready(
        model_container_forward(token_ids, emb_table, w, b,
                                max_resident_bytes=0))
    assert out_b.shape == (B, S, H)
    assert jnp.allclose(out_b, ref, atol=1e-2, rtol=1e-2), \
        float(jnp.max(jnp.abs(out_b - ref)))

    print("KERNEL_OK")
</pallas_src>

<mosaic_0001>
module attributes {stable_mosaic.version = 11 : i64} {
  func.func @gather_model_kernel(%arg0: i32, %arg1: memref<512x1xi32, #tpu.memory_space<vmem>>, %arg2: memref<256x128xbf16, #tpu.memory_space<vmem>>, %arg3: memref<1x128xf32, #tpu.memory_space<vmem>>, %arg4: memref<512x128xf32, #tpu.memory_space<vmem>>) attributes {dimension_semantics = [#tpu.dimension_semantics<parallel>], iteration_bounds = array<i64: 1>, scalar_prefetch = 0 : i64, scratch_operands = 0 : i64, tpu.core_type = #tpu.core_type<tc>, window_params = [{transform_indices = @transform_0, window_bounds = array<i64: 512, 1>}, {pipeline_mode = #tpu.pipeline_mode<synchronous>, transform_indices = @transform_1, window_bounds = array<i64: 256, 128>}, {pipeline_mode = #tpu.pipeline_mode<synchronous>, transform_indices = @transform_2, window_bounds = array<i64: 1, 128>}, {transform_indices = @transform_3, window_bounds = array<i64: 512, 128>}]} {
    %c0 = arith.constant 0 : index
    %c0_0 = arith.constant 0 : index
    %0 = vector.load %arg1[%c0, %c0_0] : memref<512x1xi32, #tpu.memory_space<vmem>>, vector<512x1xi32>
    %1 = tpu.iota {dimensions = array<i32: 1>} : vector<512x256xi32>
    %2 = vector.broadcast %0 : vector<512x1xi32> to vector<512x256xi32>
    %3 = arith.cmpi eq, %2, %1 : vector<512x256xi32>
    %4 = arith.extui %3 : vector<512x256xi1> to vector<512x256xi32>
    %5 = arith.sitofp %4 : vector<512x256xi32> to vector<512x256xf32>
    %6 = arith.truncf %5 : vector<512x256xf32> to vector<512x256xbf16>
    %c0_1 = arith.constant 0 : index
    %c0_2 = arith.constant 0 : index
    %7 = vector.load %arg2[%c0_1, %c0_2] : memref<256x128xbf16, #tpu.memory_space<vmem>>, vector<256x128xbf16>
    %cst = arith.constant dense<0.000000e+00> : vector<512x128xf32>
    %8 = tpu.matmul %6, %7, %cst {dimension_numbers = #tpu.dot_dimension_numbers<[1], [0], [0], [1], [0, 0, 1, 1], [], []>} : vector<512x256xbf16>, vector<256x128xbf16>, vector<512x128xf32> -> vector<512x128xf32>
    %c0_3 = arith.constant 0 : index
    %c0_4 = arith.constant 0 : index
    %9 = vector.load %arg3[%c0_3, %c0_4] : memref<1x128xf32, #tpu.memory_space<vmem>>, vector<1x128xf32>
    %10 = vector.broadcast %9 : vector<1x128xf32> to vector<512x128xf32>
    %11 = arith.addf %8, %10 : vector<512x128xf32>
    %12 = math.tanh %11 : vector<512x128xf32>
    %c0_5 = arith.constant 0 : index
    %c0_6 = arith.constant 0 : index
    %13 = vector.load %arg4[%c0_5, %c0_6] : memref<512x128xf32, #tpu.memory_space<vmem>>, vector<512x128xf32>
    tpu.vector_store %arg4[%c0_5, %c0_6], %12 {strides = array<i32>} : memref<512x128xf32, #tpu.memory_space<vmem>>, vector<512x128xf32>,
    return
  }
  func.func @transform_0(%arg0: i32) -> (i32, i32) {
    %c0_i32 = arith.constant 0 : i32
    %c0_i32_0 = arith.constant 0 : i32
    return %arg0, %c0_i32 : i32, i32
  }
  func.func @transform_1(%arg0: i32) -> (i32, i32) {
    %c0_i32 = arith.constant 0 : i32
    %c0_i32_0 = arith.constant 0 : i32
    %c0_i32_1 = arith.constant 0 : i32
    return %c0_i32, %c0_i32_0 : i32, i32
  }
  func.func @transform_2(%arg0: i32) -> (i32, i32) {
    %c0_i32 = arith.constant 0 : i32
    %c0_i32_0 = arith.constant 0 : i32
    %c0_i32_1 = arith.constant 0 : i32
    return %c0_i32, %c0_i32_0 : i32, i32
  }
  func.func @transform_3(%arg0: i32) -> (i32, i32) {
    %c0_i32 = arith.constant 0 : i32
    %c0_i32_0 = arith.constant 0 : i32
    return %arg0, %c0_i32 : i32, i32
  }
}

</mosaic_0001>

<bundles_post_ra>
// kernel: tpu_custom_call.1
= control target key start
LH: loop header
LB: loop body
LE: loop exit
PB: predicated region body
PF: predicated region fallthrough
CT: control target
= control target key end

     0   :  { %v1854_v3 = vmov 0   ;;  %s2465_s0 = inlined_call_operand.vmem [shape: s32[512,1], index: 0, kind: input, shape index: {}]   ;;  %s2466_s1 = inlined_call_operand.vmem [shape: bf16[256,128], index: 1, kind: input, shape index: {}]   ;;  %s2467_s2 = inlined_call_operand.vmem [shape: f32[1,128], index: 2, kind: input, shape index: {}]   ;;  %s2468_s3 = inlined_call_operand.hbm [shape: f32[512,128], index: 3, kind: output, shape index: {}]  }
   0x1   :  { %v49_v0 = vld [vmem:[%s2465_s0 + $0x110] sm:$0xff]  ;;  %v47_v1 = vld [vmem:[%s2465_s0 + $0x100] sm:$0xff]  ;;  %1697 = vset.pattern.permute.xlu2 %v1854_v3  ;;  %1696 = vset.pattern.permute.xlu1 %v1854_v3 }
   0x2   :  { %v15_v2 = vld [vmem:[%s2465_s0] sm:$0xff]  ;;  %1695 = vset.pattern.permute.xlu0 %v1854_v3  ;;  %185 = vperm.xlu2 %1697, %v49_v0  }
   0x3   :  { %179 = vperm.xlu0 %1695, %v47_v1   ;;  %83 = vperm.xlu1 %1696, %v15_v2  }
   0x4   :  { %8 = vsyncpa [#allocation3], 0  ;;  %v50_v4 = vld [vmem:[%s2465_s0 + $0x118] sm:$0xff]  ;;  %v48_v5 = vld [vmem:[%s2465_s0 + $0x108] sm:$0xff]  ;;  %v79_v62 = vlaneseq  ;;  %s1857_s14 = smov 128   ;;  %s1858_s15 = smov 8  }
   0x5   :  { %v16_v6 = vld [vmem:[%s2465_s0 + $0x8] sm:$0xff]  ;;  %v51_v7 = vld [vmem:[%s2465_s0 + $0x120] sm:$0xff]  ;;  %v17_v8 = vld [vmem:[%s2465_s0 + $0x10] sm:$0xff] }
   0x6   :  { %v18_v9 = vld [vmem:[%s2465_s0 + $0x18] sm:$0xff]  ;;  %v20_v10 = vld [vmem:[%s2465_s0 + $0x28] sm:$0xff]  ;;  %v19_v12 = vld [vmem:[%s2465_s0 + $0x20] sm:$0xff]  ;;  %v2065_v2 = vand.u32 127, %v79_v62 }
   0x7   :  { %v52_v11 = vld [vmem:[%s2465_s0 + $0x128] sm:$0xff]  ;;  %v21_v13 = vld [vmem:[%s2465_s0 + $0x30] sm:$0xff]  ;;  %v54_v15 = vld [vmem:[%s2465_s0 + $0x138] sm:$0xff] }
   0x8   :  { %v53_v14 = vld [vmem:[%s2465_s0 + $0x130] sm:$0xff]  ;;  %v56_v16 = vld [vmem:[%s2465_s0 + $0x148] sm:$0xff]  ;;  %v22_v17 = vld [vmem:[%s2465_s0 + $0x38] sm:$0xff] }
   0x9   :  { %v55_v18 = vld [vmem:[%s2465_s0 + $0x140] sm:$0xff]  ;;  %v57_v19 = vld [vmem:[%s2465_s0 + $0x150] sm:$0xff]  ;;  %v24_v21 = vld [vmem:[%s2465_s0 + $0x48] sm:$0xff] }
   0xa   :  { %188 = vperm.xlu2 %1697, %v50_v4   ;;  %v23_v20 = vld [vmem:[%s2465_s0 + $0x40] sm:$0xff]  ;;  %v26_v22 = vld [vmem:[%s2465_s0 + $0x58] sm:$0xff]  ;;  %v25_v24 = vld [vmem:[%s2465_s0 + $0x50] sm:$0xff] }
   0xb   :  { %182 = vperm.xlu0 %1695, %v48_v5   ;;  %86 = vperm.xlu1 %1696, %v16_v6   ;;  %v58_v23 = vld [vmem:[%s2465_s0 + $0x158] sm:$0xff]  ;;  %v27_v27 = vld [vmem:[%s2465_s0 + $0x60] sm:$0xff]  ;;  %v60_v29 = vld [vmem:[%s2465_s0 + $0x168] sm:$0xff]  ;;  %v2074_v5 = vadd.s32 128, %v2065_v2 }
   0xc   :  { %v1665_v25 = vld [vmem:[%s2466_s1 + $0x38] sm:$0xff]  ;;  %v59_v28 = vld [vmem:[%s2465_s0 + $0x160] sm:$0xff]  ;;  %v1664_v30 = vld [vmem:[%s2466_s1 + $0x30] sm:$0xff] }
   0xd   :  { %v1673_v26 = vld [vmem:[%s2466_s1 + $0x78] sm:$0xff]  ;;  %854 = vmatpush.bf16.msra.mxu0 %v1665_v25  ;;  %1674 = vmatpush.bf16.msra.mxu2 %v1665_v25  ;;  %v1672_v31 = vld [vmem:[%s2466_s1 + $0x70] sm:$0xff]  ;;  %v1663_v32 = vld [vmem:[%s2466_s1 + $0x28] sm:$0xff] }
   0xe   :  { %1023 = vmatpush.bf16.msra.mxu1 %v1673_v26  ;;  %1682 = vmatpush.bf16.msra.mxu3 %v1673_v26  ;;  %v1671_v33 = vld [vmem:[%s2466_s1 + $0x68] sm:$0xff]  ;;  %v62_v34 = vld [vmem:[%s2465_s0 + $0x178] sm:$0xff]  ;;  %v61_v36 = vld [vmem:[%s2465_s0 + $0x170] sm:$0xff] }
   0xf   :  { %v28_v35 = vld [vmem:[%s2465_s0 + $0x68] sm:$0xff]  ;;  %v1662_v37 = vld [vmem:[%s2466_s1 + $0x20] sm:$0xff]  ;;  %v1661_v39 = vld [vmem:[%s2466_s1 + $0x18] sm:$0xff] }
  0x10   :  { %v1670_v38 = vld [vmem:[%s2466_s1 + $0x60] sm:$0xff]  ;;  %v1669_v40 = vld [vmem:[%s2466_s1 + $0x58] sm:$0xff]  ;;  %v29_v42 = vld [vmem:[%s2465_s0 + $0x70] sm:$0xff] }
  0x11   :  { %855 = vmatpush.bf16.msra.mxu0 %v1664_v30  ;;  %1675 = vmatpush.bf16.msra.mxu2 %v1664_v30  ;;  %v63_v41 = vld [vmem:[%s2465_s0 + $0x180] sm:$0xff]  ;;  %v30_v43 = vld [vmem:[%s2465_s0 + $0x78] sm:$0xff]  ;;  %v1660_v44 = vld [vmem:[%s2466_s1 + $0x10] sm:$0xff] }
  0x12   :  { %191 = vperm.xlu2 %1697, %v51_v7   ;;  %1024 = vmatpush.bf16.msra.mxu1 %v1672_v31  ;;  %v1668_v45 = vld [vmem:[%s2466_s1 + $0x50] sm:$0xff]  ;;  %v1659_v46 = vld [vmem:[%s2466_s1 + $0x8] sm:$0xff]  ;;  %v31_v50 = vld [vmem:[%s2465_s0 + $0x80] sm:$0xff] }
  0x13   :  { %89 = vperm.xlu0 %1695, %v17_v8   ;;  %92 = vperm.xlu1 %1696, %v18_v9   ;;  %v1667_v47 = vld [vmem:[%s2466_s1 + $0x48] sm:$0xff]  ;;  %v1658_v51 = vld [vmem:[%s2466_s1] sm:$0xff]  ;;  %v33_v53 = vld [vmem:[%s2465_s0 + $0x90] sm:$0xff] }
  0x14   :  { %1683 = vmatpush.bf16.msra.mxu3 %v1672_v31  ;;  %v32_v48 = vld [vmem:[%s2465_s0 + $0x88] sm:$0xff]  ;;  %v1666_v52 = vld [vmem:[%s2466_s1 + $0x40] sm:$0xff]  ;;  %v65_v54 = vld [vmem:[%s2465_s0 + $0x190] sm:$0xff]  ;;  %s1326_s1 = sshll.u32 %s2468_s3, 4  ;;  %s1327_s1 = int_to_ptr.hbm [resolvable:$true] %s1326_s1 }
  0x15   :  { %856 = vmatpush.bf16.msra.mxu0 %v1663_v32  ;;  %1676 = vmatpush.bf16.msra.mxu2 %v1663_v32  ;;  %v64_v49 = vld [vmem:[%s2465_s0 + $0x188] sm:$0xff]  ;;  %v66_v55 = vld [vmem:[%s2465_s0 + $0x198] sm:$0xff]  ;;  %v67_v58 = vld [vmem:[%s2465_s0 + $0x1a0] sm:$0xff] }
  0x16   :  { %1025 = vmatpush.bf16.msra.mxu1 %v1671_v33  ;;  %v68_v56 = vld [vmem:[%s2465_s0 + $0x1a8] sm:$0xff]  ;;  %v34_v57 = vld [vmem:[%s2465_s0 + $0x98] sm:$0xff]  ;;  %v69_v59 = vld [vmem:[%s2465_s0 + $0x1b0] sm:$0xff] }
  0x17   :  { %v35_v60 = vld [vmem:[%s2465_s0 + $0xa0] sm:$0xff]  ;;  %v36_v61 = vld [vmem:[%s2465_s0 + $0xa8] sm:$0xff]  ;;  %v38_v1 = vld [vmem:[%s2465_s0 + $0xb8] sm:$0xff] }
  0x18   :  { %1684 = vmatpush.bf16.msra.mxu3 %v1671_v33  ;;  %v70_v3 = vld [vmem:[%s2465_s0 + $0x1b8] sm:$0xff]  ;;  %v37_v4 = vld [vmem:[%s2465_s0 + $0xb0] sm:$0xff]  ;;  %v39_v9 = vld [vmem:[%s2465_s0 + $0xc0] sm:$0xff] }
  0x19   :  { %857 = vmatpush.bf16.msra.mxu0 %v1662_v37  ;;  %1677 = vmatpush.bf16.msra.mxu2 %v1662_v37  ;;  %v76_v25 = vld [vmem:[%s2465_s0 + $0x1e8] sm:$0xff]  ;;  %v45_v30 = vld [vmem:[%s2465_s0 + $0xf0] sm:$0xff]  ;;  %v78_v32 = vld [vmem:[%s2465_s0 + $0x1f8] sm:$0xff] }
  0x1a   :  { %98 = vperm.xlu2 %1697, %v20_v10   ;;  %1026 = vmatpush.bf16.msra.mxu1 %v1670_v38  ;;  %v1855_v10 = vmov 1.0|1.0   ;;  %v77_v31 = vld [vmem:[%s2465_s0 + $0x1f0] sm:$0xff] }
  0x1b   :  { %194 = vperm.xlu0 %1695, %v52_v11   ;;  %95 = vperm.xlu1 %1696, %v19_v12   ;;  %v71_v11 = vld [vmem:[%s2465_s0 + $0x1c0] sm:$0xff]  ;;  %v72_v12 = vld [vmem:[%s2465_s0 + $0x1c8] sm:$0xff] }
  0x1c   :  { %1685 = vmatpush.bf16.msra.mxu3 %v1670_v38 }
  0x1d   :  { %858 = vmatpush.bf16.msra.mxu0 %v1661_v39  ;;  %1678 = vmatpush.bf16.msra.mxu2 %v1661_v39 }
  0x1e   :  { %1027 = vmatpush.bf16.msra.mxu1 %v1669_v40 }
  0x20   :  { %1686 = vmatpush.bf16.msra.mxu3 %v1669_v40 }
  0x21   :  { %859 = vmatpush.bf16.msra.mxu0 %v1660_v44  ;;  %1679 = vmatpush.bf16.msra.mxu2 %v1660_v44 }
  0x22   :  { %101 = vperm.xlu2 %1697, %v21_v13   ;;  %1028 = vmatpush.bf16.msra.mxu1 %v1668_v45  ;;  %v74_v13 = vld [vmem:[%s2465_s0 + $0x1d8] sm:$0xff] }
  0x23   :  { %197 = vperm.xlu0 %1695, %v53_v14   ;;  %200 = vperm.xlu1 %1696, %v54_v15   ;;  %v40_v15 = vld [vmem:[%s2465_s0 + $0xc8] sm:$0xff] }
  0x24   :  { %1687 = vmatpush.bf16.msra.mxu3 %v1668_v45 }
  0x25   :  { %860 = vmatpush.bf16.msra.mxu0 %v1659_v46  ;;  %1680 = vmatpush.bf16.msra.mxu2 %v1659_v46 }
  0x26   :  { %1029 = vmatpush.bf16.msra.mxu1 %v1667_v47 }
  0x28   :  { %1688 = vmatpush.bf16.msra.mxu3 %v1667_v47 }
  0x29   :  { %861 = vmatpush.bf16.msra.mxu0 %v1658_v51  ;;  %1681 = vmatpush.bf16.msra.mxu2 %v1658_v51 }
  0x2a   :  { %206 = vperm.xlu2 %1697, %v56_v16   ;;  %1030 = vmatpush.bf16.msra.mxu1 %v1666_v52 }
  0x2b   :  { %104 = vperm.xlu0 %1695, %v22_v17   ;;  %203 = vperm.xlu1 %1696, %v55_v18   ;;  %v73_v18 = vld [vmem:[%s2465_s0 + $0x1d0] sm:$0xff] }
  0x2c   :  { %1689 = vmatpush.bf16.msra.mxu3 %v1666_v52 }
  0x32   :  { %209 = vperm.xlu2 %1697, %v57_v19   ;;  %v75_v19 = vld [vmem:[%s2465_s0 + $0x1e0] sm:$0xff] }
  0x33   :  { %107 = vperm.xlu0 %1695, %v23_v20   ;;  %110 = vperm.xlu1 %1696, %v24_v21   ;;  %v41_v20 = vld [vmem:[%s2465_s0 + $0xd0] sm:$0xff]  ;;  %v42_v21 = vld [vmem:[%s2465_s0 + $0xd8] sm:$0xff] }
  0x3a   :  { %116 = vperm.xlu2 %1697, %v26_v22  }
  0x3b   :  { %212 = vperm.xlu0 %1695, %v58_v23   ;;  %113 = vperm.xlu1 %1696, %v25_v24   ;;  %v44_v24 = vld [vmem:[%s2465_s0 + $0xe8] sm:$0xff] }
  0x42   :  { %119 = vperm.xlu2 %1697, %v27_v27   ;;  %v43_v27 = vld [vmem:[%s2465_s0 + $0xe0] sm:$0xff] }
  0x43   :  { %215 = vperm.xlu0 %1695, %v59_v28   ;;  %218 = vperm.xlu1 %1696, %v60_v29  }
  0x4a   :  { %224 = vperm.xlu2 %1697, %v62_v34   ;;  %v46_v34 = vld [vmem:[%s2465_s0 + $0xf8] sm:$0xff] }
  0x4b   :  { %122 = vperm.xlu0 %1695, %v28_v35   ;;  %221 = vperm.xlu1 %1696, %v61_v36  }
  0x52   :  { %227 = vperm.xlu2 %1697, %v63_v41  }
  0x53   :  { %125 = vperm.xlu0 %1695, %v29_v42   ;;  %128 = vperm.xlu1 %1696, %v30_v43  }
  0x5a   :  { %134 = vperm.xlu2 %1697, %v32_v48  }
  0x5b   :  { %230 = vperm.xlu0 %1695, %v64_v49   ;;  %131 = vperm.xlu1 %1696, %v31_v50  }
  0x5c   :  { %v186_v8 = vpop.permute.xlu2 %185 }
  0x5d   :  { %vm342_vm14 = vcmp.eq.s32.totalorder %v186_v8, %v2065_v2 }
  0x62   :  { %137 = vperm.xlu2 %1697, %v33_v53  }
  0x63   :  { %233 = vperm.xlu0 %1695, %v65_v54   ;;  %236 = vperm.xlu1 %1696, %v66_v55  }
  0x64   :  { %v189_v14 = vpop.permute.xlu2 %188 }
  0x65   :  { %vm344_vm15 = vcmp.eq.s32.totalorder %v189_v14, %v2065_v2 }
  0x6a   :  { %242 = vperm.xlu2 %1697, %v68_v56   ;;  %v2223_v56 = vld [vmem:[%s2467_s2] ss:$0 sm:$0xff] }
  0x6b   :  { %140 = vperm.xlu0 %1695, %v34_v57   ;;  %239 = vperm.xlu1 %1696, %v67_v58  }
  0x6c   :  { %v192_v22 = vpop.permute.xlu2 %191 }
  0x72   :  { %245 = vperm.xlu2 %1697, %v69_v59  }
  0x73   :  { %143 = vperm.xlu0 %1695, %v35_v60   ;;  %146 = vperm.xlu1 %1696, %v36_v61  }
  0x74   :  { %v99_v28 = vpop.permute.xlu2 %98 }
  0x75   :  { %v180_v63 = vpop.permute.xlu0 %179  ;;  %v84_v0 = vpop.permute.xlu1 %83 }
  0x76   :  { %vm274_vm0 = vcmp.eq.s32.totalorder %v84_v0, %v2065_v2  ;;  %vm338_vm4 = vcmp.eq.s32.totalorder %v180_v63, %v2065_v2  ;;  %vm275_vm7 = vcmp.eq.s32.totalorder %v84_v0, %v2074_v5  ;;  %vm339_vm9 = vcmp.eq.s32.totalorder %v180_v63, %v2074_v5 }
  0x7a   :  { %152 = vperm.xlu2 %1697, %v38_v1  }
  0x7b   :  { %248 = vperm.xlu0 %1695, %v70_v3   ;;  %149 = vperm.xlu1 %1696, %v37_v4  }
  0x7c   :  { %v102_v36 = vpop.permute.xlu2 %101 }
  0x7d   :  { %v183_v6 = vpop.permute.xlu0 %182  ;;  %v87_v7 = vpop.permute.xlu1 %86 }
  0x7e   :  { %vm340_vm1 = vcmp.eq.s32.totalorder %v183_v6, %v2065_v2  ;;  %vm276_vm2 = vcmp.eq.s32.totalorder %v87_v7, %v2065_v2  ;;  %vm277_vm3 = vcmp.eq.s32.totalorder %v87_v7, %v2074_v5  ;;  %vm341_vm5 = vcmp.eq.s32.totalorder %v183_v6, %v2074_v5 }
  0x7f   :  { %vm1530_vm6 = vmpackc.low %vm276_vm2, %vm274_vm0  ;;  %vm343_vm2 = vcmp.eq.s32.totalorder %v186_v8, %v2074_v5 }
  0x80   :  { %1531 = vmatmul.msk.bf16.vlgmr.msra.gmra.mxu0 %vm1530_vm6, %v1855_v10  ;;  %vm1562_vm8 = vmpackc.low %vm340_vm1, %vm338_vm4 }
  0x81   :  { %1563 = vmatmul.msk.bf16.vlgmr.msra.gmra.mxu2 %vm1562_vm8, %v1855_v10  ;;  %vm1594_vm10 = vmpackc.low %vm277_vm3, %vm275_vm7  ;;  %vm345_vm3 = vcmp.eq.s32.totalorder %v189_v14, %v2074_v5 }
  0x82   :  { %1595 = vmatmul.msk.bf16.vlgmr.msra.gmra.mxu1 %vm1594_vm10, %v1855_v10  ;;  %vm1626_vm11 = vmpackc.low %vm341_vm5, %vm339_vm9  ;;  %155 = vperm.xlu2 %1697, %v39_v9   ;;  %vm284_vm10 = vcmp.eq.s32.totalorder %v99_v28, %v2065_v2 }
  0x83   :  { %1627 = vmatmul.msk.bf16.vlgmr.msra.gmra.mxu3 %vm1626_vm11, %v1855_v10  ;;  %251 = vperm.xlu0 %1695, %v71_v11   ;;  %vm1564_vm5 = vmpackc.low %vm344_vm15, %vm342_vm14  ;;  %vm285_vm15 = vcmp.eq.s32.totalorder %v99_v28, %v2074_v5 }
  0x84   :  { %254 = vperm.xlu1 %1696, %v72_v12   ;;  %vm1628_vm7 = vmpackc.low %vm345_vm3, %vm343_vm2  ;;  %v207_v38 = vpop.permute.xlu2 %206 }
  0x85   :  { %v90_v16 = vpop.permute.xlu0 %89  ;;  %v93_v17 = vpop.permute.xlu1 %92 }
  0x86   :  { %vm278_vm12 = vcmp.eq.s32.totalorder %v90_v16, %v2065_v2  ;;  %vm280_vm13 = vcmp.eq.s32.totalorder %v93_v17, %v2065_v2  ;;  %vm279_vm0 = vcmp.eq.s32.totalorder %v90_v16, %v2074_v5  ;;  %vm281_vm1 = vcmp.eq.s32.totalorder %v93_v17, %v2074_v5 }
  0x87   :  { %vm1532_vm4 = vmpackc.low %vm280_vm13, %vm278_vm12  ;;  %vm346_vm12 = vcmp.eq.s32.totalorder %v192_v22, %v2065_v2 }
  0x88   :  { %vm1596_vm6 = vmpackc.low %vm281_vm1, %vm279_vm0  ;;  %vm347_vm1 = vcmp.eq.s32.totalorder %v192_v22, %v2074_v5 }
  0x8a   :  { %260 = vperm.xlu2 %1697, %v74_v13  }
  0x8b   :  { %158 = vperm.xlu0 %1695, %v40_v15  }
  0x8c   :  { %257 = vperm.xlu1 %1696, %v73_v18   ;;  %v210_v41 = vpop.permute.xlu2 %209 }
  0x8d   :  { %v195_v23 = vpop.permute.xlu0 %194  ;;  %v96_v26 = vpop.permute.xlu1 %95 }
  0x8e   :  { %vm282_vm8 = vcmp.eq.s32.totalorder %v96_v26, %v2065_v2  ;;  %vm348_vm9 = vcmp.eq.s32.totalorder %v195_v23, %v2065_v2  ;;  %vm283_vm11 = vcmp.eq.s32.totalorder %v96_v26, %v2074_v5  ;;  %vm349_vm13 = vcmp.eq.s32.totalorder %v195_v23, %v2074_v5 }
  0x8f   :  { %vm1534_vm14 = vmpackc.low %vm284_vm10, %vm282_vm8 }
  0x90   :  { %1533 = vmatmul.msk.bf16.gmra.mxu0 %vm1532_vm4, %v1855_v10  ;;  %vm1566_vm0 = vmpackc.low %vm348_vm9, %vm346_vm12  ;;  %vm287_vm12 = vcmp.eq.s32.totalorder %v102_v36, %v2074_v5 }
  0x91   :  { %1565 = vmatmul.msk.bf16.gmra.mxu2 %vm1564_vm5, %v1855_v10  ;;  %vm1598_vm2 = vmpackc.low %vm285_vm15, %vm283_vm11 }
  0x92   :  { %1597 = vmatmul.msk.bf16.gmra.mxu1 %vm1596_vm6, %v1855_v10  ;;  %263 = vperm.xlu2 %1697, %v75_v19   ;;  %vm1630_vm3 = vmpackc.low %vm349_vm13, %vm347_vm1 }
  0x93   :  { %1629 = vmatmul.msk.bf16.gmra.mxu3 %vm1628_vm7, %v1855_v10  ;;  %161 = vperm.xlu0 %1695, %v41_v20   ;;  %vm286_vm7 = vcmp.eq.s32.totalorder %v102_v36, %v2065_v2 }
  0x94   :  { %164 = vperm.xlu1 %1696, %v42_v21   ;;  %v117_v44 = vpop.permute.xlu2 %116 }
  0x95   :  { %v198_v29 = vpop.permute.xlu0 %197  ;;  %v201_v33 = vpop.permute.xlu1 %200 }
  0x96   :  { %vm350_vm5 = vcmp.eq.s32.totalorder %v198_v29, %v2065_v2  ;;  %vm352_vm6 = vcmp.eq.s32.totalorder %v201_v33, %v2065_v2  ;;  %vm351_vm9 = vcmp.eq.s32.totalorder %v198_v29, %v2074_v5  ;;  %vm353_vm10 = vcmp.eq.s32.totalorder %v201_v33, %v2074_v5 }
  0x97   :  { %vm1568_vm13 = vmpackc.low %vm352_vm6, %vm350_vm5  ;;  %vm356_vm5 = vcmp.eq.s32.totalorder %v207_v38, %v2065_v2 }
  0x98   :  { %vm1632_vm15 = vmpackc.low %vm353_vm10, %vm351_vm9  ;;  %vm357_vm9 = vcmp.eq.s32.totalorder %v207_v38, %v2074_v5 }
  0x9a   :  { %170 = vperm.xlu2 %1697, %v44_v24  }
  0x9b   :  { %266 = vperm.xlu0 %1695, %v76_v25  }
  0x9c   :  { %167 = vperm.xlu1 %1696, %v43_v27   ;;  %v120_v48 = vpop.permute.xlu2 %119 }
  0x9d   :  { %v105_v35 = vpop.permute.xlu0 %104  ;;  %v204_v37 = vpop.permute.xlu1 %203 }
  0x9e   :  { %vm288_vm4 = vcmp.eq.s32.totalorder %v105_v35, %v2065_v2  ;;  %vm289_vm8 = vcmp.eq.s32.totalorder %v105_v35, %v2074_v5  ;;  %vm355_vm6 = vcmp.eq.s32.totalorder %v204_v37, %v2074_v5 }
  0x9f   :  { %vm1536_vm11 = vmpackc.low %vm288_vm4, %vm286_vm7 }
  0xa0   :  { %1535 = vmatmul.msk.bf16.gmra.mxu0 %vm1534_vm14, %v1855_v10  ;;  %vm1600_vm14 = vmpackc.low %vm289_vm8, %vm287_vm12 }
  0xa1   :  { %1567 = vmatmul.msk.bf16.gmra.mxu2 %vm1566_vm0, %v1855_v10 }
  0xa2   :  { %1599 = vmatmul.msk.bf16.gmra.mxu1 %vm1598_vm2, %v1855_v10  ;;  %173 = vperm.xlu2 %1697, %v45_v30   ;;  %vm354_vm2 = vcmp.eq.s32.totalorder %v204_v37, %v2065_v2 }
  0xa3   :  { %1631 = vmatmul.msk.bf16.gmra.mxu3 %vm1630_vm3, %v1855_v10  ;;  %269 = vperm.xlu0 %1695, %v77_v31   ;;  %vm1570_vm8 = vmpackc.low %vm356_vm5, %vm354_vm2  ;;  %vm359_vm5 = vcmp.eq.s32.totalorder %v210_v41, %v2074_v5 }
  0xa4   :  { %272 = vperm.xlu1 %1696, %v78_v32   ;;  %v225_v50 = vpop.permute.xlu2 %224 }
  0xa5   :  { %v108_v39 = vpop.permute.xlu0 %107  ;;  %v111_v40 = vpop.permute.xlu1 %110 }
  0xa6   :  { %vm290_vm0 = vcmp.eq.s32.totalorder %v108_v39, %v2065_v2  ;;  %vm292_vm1 = vcmp.eq.s32.totalorder %v111_v40, %v2065_v2  ;;  %vm291_vm3 = vcmp.eq.s32.totalorder %v108_v39, %v2074_v5  ;;  %vm293_vm4 = vcmp.eq.s32.totalorder %v111_v40, %v2074_v5 }
  0xa7   :  { %vm1538_vm7 = vmpackc.low %vm292_vm1, %vm290_vm0  ;;  %vm358_vm0 = vcmp.eq.s32.totalorder %v210_v41, %v2065_v2 }
  0xa8   :  { %vm1602_vm10 = vmpackc.low %vm293_vm4, %vm291_vm3  ;;  %vm297_vm3 = vcmp.eq.s32.totalorder %v117_v44, %v2074_v5 }
  0xab   :  { %176 = vperm.xlu0 %1695, %v46_v34  }
  0xac   :  { %v228_v53 = vpop.permute.xlu2 %227 }
  0xad   :  { %v213_v42 = vpop.permute.xlu0 %212  ;;  %v114_v43 = vpop.permute.xlu1 %113 }
  0xae   :  { %vm294_vm12 = vcmp.eq.s32.totalorder %v114_v43, %v2065_v2  ;;  %vm361_vm1 = vcmp.eq.s32.totalorder %v213_v42, %v2074_v5 }
  0xb0   :  { %1537 = vmatmul.msk.bf16.gmra.mxu0 %vm1536_vm11, %v1855_v10  ;;  %vm1634_vm11 = vmpackc.low %vm357_vm9, %vm355_vm6 }
  0xb1   :  { %1569 = vmatmul.msk.bf16.gmra.mxu2 %vm1568_vm13, %v1855_v10  ;;  %vm360_vm13 = vcmp.eq.s32.totalorder %v213_v42, %v2065_v2 }
  0xb2   :  { %1601 = vmatmul.msk.bf16.gmra.mxu1 %vm1600_vm14, %v1855_v10  ;;  %vm296_vm14 = vcmp.eq.s32.totalorder %v117_v44, %v2065_v2  ;;  %vm1572_vm4 = vmpackc.low %vm360_vm13, %vm358_vm0  ;;  %vm299_vm0 = vcmp.eq.s32.totalorder %v120_v48, %v2074_v5 }
  0xb3   :  { %1633 = vmatmul.msk.bf16.gmra.mxu3 %vm1632_vm15, %v1855_v10  ;;  %vm295_vm15 = vcmp.eq.s32.totalorder %v114_v43, %v2074_v5  ;;  %vm1540_vm2 = vmpackc.low %vm296_vm14, %vm294_vm12 }
  0xb4   :  { %vm1604_vm6 = vmpackc.low %vm297_vm3, %vm295_vm15  ;;  %v135_v57 = vpop.permute.xlu2 %134 }
  0xb5   :  { %v216_v45 = vpop.permute.xlu0 %215  ;;  %v219_v46 = vpop.permute.xlu1 %218 }
  0xb6   :  { %vm362_vm9 = vcmp.eq.s32.totalorder %v216_v45, %v2065_v2  ;;  %vm363_vm13 = vcmp.eq.s32.totalorder %v216_v45, %v2074_v5  ;;  %vm365_vm14 = vcmp.eq.s32.totalorder %v219_v46, %v2074_v5 }
  0xb7   :  { %vm1638_vm3 = vmpackc.low %vm365_vm14, %vm363_vm13  ;;  %vm369_vm13 = vcmp.eq.s32.totalorder %v225_v50, %v2074_v5 }
  0xbc   :  { %v138_v13 = vpop.permute.xlu2 %137 }
  0xbd   :  { %v123_v47 = vpop.permute.xlu0 %122  ;;  %v222_v49 = vpop.permute.xlu1 %221 }
  0xbe   :  { %vm301_vm12 = vcmp.eq.s32.totalorder %v123_v47, %v2074_v5 }
  0xc0   :  { %1539 = vmatmul.msk.bf16.gmra.mxu0 %vm1538_vm7, %v1855_v10  ;;  %vm1636_vm7 = vmpackc.low %vm361_vm1, %vm359_vm5 }
  0xc1   :  { %1571 = vmatmul.msk.bf16.gmra.mxu2 %vm1570_vm8, %v1855_v10  ;;  %vm300_vm8 = vcmp.eq.s32.totalorder %v123_v47, %v2065_v2 }
  0xc2   :  { %1603 = vmatmul.msk.bf16.gmra.mxu1 %vm1602_vm10, %v1855_v10  ;;  %vm364_vm10 = vcmp.eq.s32.totalorder %v219_v46, %v2065_v2 }
  0xc3   :  { %1635 = vmatmul.msk.bf16.gmra.mxu3 %vm1634_vm11, %v1855_v10  ;;  %vm298_vm11 = vcmp.eq.s32.totalorder %v120_v48, %v2065_v2  ;;  %vm1574_vm1 = vmpackc.low %vm364_vm10, %vm362_vm9  ;;  %vm368_vm9 = vcmp.eq.s32.totalorder %v225_v50, %v2065_v2  ;;  %vm367_vm10 = vcmp.eq.s32.totalorder %v222_v49, %v2074_v5 }
  0xc4   :  { %vm1542_vm15 = vmpackc.low %vm300_vm8, %vm298_vm11  ;;  %v243_v31 = vpop.permute.xlu2 %242 }
  0xc5   :  { %v126_v51 = vpop.permute.xlu0 %125  ;;  %v129_v52 = vpop.permute.xlu1 %128 }
  0xc6   :  { %vm304_vm5 = vcmp.eq.s32.totalorder %v129_v52, %v2065_v2  ;;  %vm305_vm8 = vcmp.eq.s32.totalorder %v129_v52, %v2074_v5 }
  0xcc   :  { %v246_v48 = vpop.permute.xlu2 %245 }
  0xcd   :  { %v231_v54 = vpop.permute.xlu0 %230  ;;  %v132_v55 = vpop.permute.xlu1 %131 }
  0xd0   :  { %1541 = vmatmul.msk.bf16.gmra.mxu0 %vm1540_vm2, %v1855_v10  ;;  %vm1606_vm2 = vmpackc.low %vm301_vm12, %vm299_vm0  ;;  %vm306_vm0 = vcmp.eq.s32.totalorder %v132_v55, %v2065_v2 }
  0xd1   :  { %1573 = vmatmul.msk.bf16.gmra.mxu2 %vm1572_vm4, %v1855_v10  ;;  %vm302_vm4 = vcmp.eq.s32.totalorder %v126_v51, %v2065_v2 }
  0xd2   :  { %1605 = vmatmul.msk.bf16.gmra.mxu1 %vm1604_vm6, %v1855_v10  ;;  %vm366_vm6 = vcmp.eq.s32.totalorder %v222_v49, %v2065_v2  ;;  %vm1544_vm11 = vmpackc.low %vm304_vm5, %vm302_vm4  ;;  %vm370_vm4 = vcmp.eq.s32.totalorder %v228_v53, %v2065_v2  ;;  %vm373_vm5 = vcmp.eq.s32.totalorder %v231_v54, %v2074_v5 }
  0xd3   :  { %1637 = vmatmul.msk.bf16.gmra.mxu3 %vm1636_vm7, %v1855_v10  ;;  %vm303_vm7 = vcmp.eq.s32.totalorder %v126_v51, %v2074_v5  ;;  %vm1576_vm12 = vmpackc.low %vm368_vm9, %vm366_vm6  ;;  %vm371_vm9 = vcmp.eq.s32.totalorder %v228_v53, %v2074_v5 }
  0xd4   :  { %vm1608_vm14 = vmpackc.low %vm305_vm8, %vm303_vm7  ;;  %vm309_vm7 = vcmp.eq.s32.totalorder %v135_v57, %v2074_v5 }
  0xd5   :  { %v234_v60 = vpop.permute.xlu0 %233  ;;  %v237_v0 = vpop.permute.xlu1 %236 }
  0xdd   :  { %v141_v12 = vpop.permute.xlu0 %140  ;;  %v2249_v20 = vpop.permute.xlu1 %239 }
  0xe0   :  { %1543 = vmatmul.msk.bf16.gmra.mxu0 %vm1542_vm15, %v1855_v10  ;;  %vm1640_vm15 = vmpackc.low %vm369_vm13, %vm367_vm10  ;;  %vm374_vm13 = vcmp.eq.s32.totalorder %v234_v60, %v2065_v2 }
  0xe1   :  { %1575 = vmatmul.msk.bf16.gmra.mxu2 %vm1574_vm1, %v1855_v10  ;;  %vm372_vm1 = vcmp.eq.s32.totalorder %v231_v54, %v2065_v2 }
  0xe2   :  { %1607 = vmatmul.msk.bf16.gmra.mxu1 %vm1606_vm2, %v1855_v10  ;;  %vm308_vm2 = vcmp.eq.s32.totalorder %v135_v57, %v2065_v2  ;;  %vm1578_vm8 = vmpackc.low %vm372_vm1, %vm370_vm4  ;;  %vm375_vm1 = vcmp.eq.s32.totalorder %v234_v60, %v2074_v5  ;;  %vm311_vm4 = vcmp.eq.s32.totalorder %v138_v13, %v2074_v5 }
  0xe3   :  { %1639 = vmatmul.msk.bf16.gmra.mxu3 %vm1638_vm3, %v1855_v10  ;;  %vm307_vm3 = vcmp.eq.s32.totalorder %v132_v55, %v2074_v5  ;;  %vm1546_vm6 = vmpackc.low %vm308_vm2, %vm306_vm0  ;;  %vm313_vm0 = vcmp.eq.s32.totalorder %v141_v12, %v2074_v5  ;;  %vm377_vm2 = vcmp.eq.s32.totalorder %v237_v0, %v2074_v5 }
  0xe4   :  { %vm1610_vm10 = vmpackc.low %vm309_vm7, %vm307_vm3 }
  0xe5   :  { %vm1644_vm7 = vmpackc.low %vm377_vm2, %vm375_vm1  ;;  %v144_v36 = vpop.permute.xlu0 %143  ;;  %v147_v37 = vpop.permute.xlu1 %146  ;;  %vm381_vm1 = vcmp.eq.s32.totalorder %v243_v31, %v2074_v5 }
  0xed   :  { %v249_v50 = vpop.permute.xlu0 %248 }
  0xf0   :  { %1545 = vmatmul.msk.bf16.gmra.mxu0 %vm1544_vm11, %v1855_v10  ;;  %vm1642_vm11 = vmpackc.low %vm373_vm5, %vm371_vm9  ;;  %vm316_vm9 = vcmp.eq.s32.totalorder %v147_v37, %v2065_v2 }
  0xf1   :  { %1577 = vmatmul.msk.bf16.gmra.mxu2 %vm1576_vm12, %v1855_v10  ;;  %vm312_vm12 = vcmp.eq.s32.totalorder %v141_v12, %v2065_v2 }
  0xf2   :  { %1609 = vmatmul.msk.bf16.gmra.mxu1 %vm1608_vm14, %v1855_v10  ;;  %vm376_vm14 = vcmp.eq.s32.totalorder %v237_v0, %v2065_v2 }
  0xf3   :  { %1641 = vmatmul.msk.bf16.gmra.mxu3 %vm1640_vm15, %v1855_v10  ;;  %vm310_vm15 = vcmp.eq.s32.totalorder %v138_v13, %v2065_v2  ;;  %vm1580_vm5 = vmpackc.low %vm376_vm14, %vm374_vm13  ;;  %vm380_vm13 = vcmp.eq.s32.totalorder %v243_v31, %v2065_v2  ;;  %vm379_vm14 = vcmp.eq.s32.totalorder %v2249_v20, %v2074_v5 }
  0xf4   :  { %vm1548_vm3 = vmpackc.low %vm312_vm12, %vm310_vm15  ;;  %vm317_vm12 = vcmp.eq.s32.totalorder %v147_v37, %v2074_v5 }
  0xfd   :  { %v863_v58 = vpop.f32.mrf.mxu0 }
  0xfe   :  { %v864_v59 = vadd.f32 %v2223_v56, %v863_v58 }
  0xff   :  { %v1032_v61 = vpop.f32.mrf.mxu1 }
 0x100   :  { %v1033_v62 = vadd.f32 %v1032_v61, %v864_v59  ;;  %1547 = vmatmul.msk.bf16.gmra.mxu0 %vm1546_vm6, %v1855_v10  ;;  %vm1612_vm6 = vmpackc.low %vm313_vm0, %vm311_vm4  ;;  %v150_v61 = vpop.permute.xlu1 %149 }
 0x101   :  { %1579 = vmatmul.msk.bf16.gmra.mxu2 %vm1578_vm8, %v1855_v10  ;;  %vm314_vm8 = vcmp.eq.s32.totalorder %v144_v36, %v2065_v2  ;;  %vm318_vm4 = vcmp.eq.s32.totalorder %v150_v61, %v2065_v2 }
 0x102   :  { %1699 = vtanh.f32 %v1033_v62  ;;  %1611 = vmatmul.msk.bf16.gmra.mxu1 %vm1610_vm10, %v1855_v10  ;;  %vm378_vm10 = vcmp.eq.s32.totalorder %v2249_v20, %v2065_v2  ;;  %vm1550_vm15 = vmpackc.low %vm316_vm9, %vm314_vm8  ;;  %v153_v62 = vpop.permute.xlu2 %152  ;;  %vm382_vm8 = vcmp.eq.s32.totalorder %v246_v48, %v2065_v2  ;;  %vm385_vm9 = vcmp.eq.s32.totalorder %v249_v50, %v2074_v5 }
 0x103   :  { %1643 = vmatmul.msk.bf16.gmra.mxu3 %vm1642_vm11, %v1855_v10  ;;  %vm315_vm11 = vcmp.eq.s32.totalorder %v144_v36, %v2074_v5  ;;  %vm1582_vm0 = vmpackc.low %vm380_vm13, %vm378_vm10  ;;  %vm383_vm13 = vcmp.eq.s32.totalorder %v246_v48, %v2074_v5 }
 0x104   :  { %v943_v63 = vpop.f32.mrf.mxu2  ;;  %vm1614_vm2 = vmpackc.low %vm317_vm12, %vm315_vm11  ;;  %vm321_vm11 = vcmp.eq.s32.totalorder %v153_v62, %v2074_v5 }
 0x105   :  { %v944_v1 = vadd.f32 %v2223_v56, %v943_v63  ;;  %v865_v3 = vpop.f32.mrf.mxu0 }
 0x106   :  { %v1112_v4 = vpop.f32.mrf.mxu3  ;;  %v866_v6 = vadd.f32 %v2223_v56, %v865_v3 }
 0x107   :  { %v1113_v7 = vadd.f32 %v1112_v4, %v944_v1  ;;  %v1034_v8 = vpop.f32.mrf.mxu1 }
 0x108   :  { %v1700_v9 = vpop.eup %1699  ;;  %v1035_v11 = vadd.f32 %v1034_v8, %v866_v6 }
 0x109   :  { %1256 = vst [vmem:[#allocation2] sm:$0xff] %v1700_v9  ;;  %1701 = vtanh.f32 %v1113_v7  ;;  %v2308_v7 = vpop.permute.xlu0 %251 }
 0x10a   :  { %1703 = vtanh.f32 %v1035_v11 }
 0x10c   :  { %v945_v14 = vpop.f32.mrf.mxu2 }
 0x10d   :  { %v946_v15 = vadd.f32 %v2223_v56, %v945_v14  ;;  %v868_v16 = vpop.f32.mrf.mxu0  ;;  %v255_v14 = vpop.permute.xlu1 %254 }
 0x10e   :  { %v1114_v17 = vpop.f32.mrf.mxu3  ;;  %v869_v18 = vadd.f32 %v2223_v56, %v868_v16 }
 0x10f   :  { %v1702_v19 = vpop.eup %1701  ;;  %v1115_v21 = vadd.f32 %v1114_v17, %v946_v15  ;;  %v1037_v22 = vpop.f32.mrf.mxu1 }
 0x110   :  { %v1704_v23 = vpop.eup %1703  ;;  %1288 = vst [vmem:[#allocation2 + $0x100] sm:$0xff] %v1702_v19  ;;  %v1038_v24 = vadd.f32 %v1037_v22, %v869_v18  ;;  %1549 = vmatmul.msk.bf16.gmra.mxu0 %vm1548_vm3, %v1855_v10  ;;  %vm1646_vm3 = vmpackc.low %vm381_vm1, %vm379_vm14  ;;  %vm386_vm1 = vcmp.eq.s32.totalorder %v2308_v7, %v2065_v2 }
 0x111   :  { %1257 = vst [vmem:[#allocation2 + $0x8] sm:$0xff] %v1704_v23  ;;  %1705 = vtanh.f32 %v1115_v21  ;;  %1581 = vmatmul.msk.bf16.gmra.mxu2 %vm1580_vm5, %v1855_v10  ;;  %vm384_vm5 = vcmp.eq.s32.totalorder %v249_v50, %v2065_v2 }
 0x112   :  { %1707 = vtanh.f32 %v1038_v24  ;;  %1613 = vmatmul.msk.bf16.gmra.mxu1 %vm1612_vm6, %v1855_v10  ;;  %vm320_vm6 = vcmp.eq.s32.totalorder %v153_v62, %v2065_v2  ;;  %vm1584_vm12 = vmpackc.low %vm384_vm5, %vm382_vm8  ;;  %v159_v24 = vpop.permute.xlu0 %158  ;;  %vm387_vm5 = vcmp.eq.s32.totalorder %v2308_v7, %v2074_v5 }
 0x113   :  { %1645 = vmatmul.msk.bf16.gmra.mxu3 %vm1644_vm7, %v1855_v10  ;;  %vm319_vm7 = vcmp.eq.s32.totalorder %v150_v61, %v2074_v5  ;;  %vm1552_vm10 = vmpackc.low %vm320_vm6, %vm318_vm4  ;;  %vm325_vm4 = vcmp.eq.s32.totalorder %v159_v24, %v2074_v5  ;;  %vm389_vm6 = vcmp.eq.s32.totalorder %v255_v14, %v2074_v5 }
 0x114   :  { %v948_v25 = vpop.f32.mrf.mxu2  ;;  %vm1616_vm14 = vmpackc.low %vm321_vm11, %vm319_vm7 }
 0x115   :  { %v949_v26 = vadd.f32 %v2223_v56, %v948_v25  ;;  %v870_v27 = vpop.f32.mrf.mxu0  ;;  %v156_v25 = vpop.permute.xlu2 %155  ;;  %vm1650_vm11 = vmpackc.low %vm389_vm6, %vm387_vm5 }
 0x116   :  { %v1117_v28 = vpop.f32.mrf.mxu3  ;;  %v871_v29 = vadd.f32 %v2223_v56, %v870_v27  ;;  %vm323_vm8 = vcmp.eq.s32.totalorder %v156_v25, %v2074_v5 }
 0x117   :  { %v1706_v30 = vpop.eup %1705  ;;  %v1118_v32 = vadd.f32 %v1117_v28, %v949_v26  ;;  %v1039_v33 = vpop.f32.mrf.mxu1 }
 0x118   :  { %v1708_v34 = vpop.eup %1707  ;;  %1289 = vst [vmem:[#allocation2 + $0x108] sm:$0xff] %v1706_v30  ;;  %v1040_v35 = vadd.f32 %v1039_v33, %v871_v29 }
 0x119   :  { %1258 = vst [vmem:[#allocation2 + $0x10] sm:$0xff] %v1708_v34  ;;  %1709 = vtanh.f32 %v1118_v32  ;;  %v258_v32 = vpop.permute.xlu1 %257 }
 0x11a   :  { %1711 = vtanh.f32 %v1040_v35  ;;  %v162_v48 = vpop.permute.xlu0 %161 }
 0x11c   :  { %v950_v38 = vpop.f32.mrf.mxu2 }
 0x11d   :  { %v951_v39 = vadd.f32 %v2223_v56, %v950_v38  ;;  %v873_v40 = vpop.f32.mrf.mxu0 }
 0x11e   :  { %v1119_v41 = vpop.f32.mrf.mxu3  ;;  %v874_v42 = vadd.f32 %v2223_v56, %v873_v40 }
 0x11f   :  { %v1710_v43 = vpop.eup %1709  ;;  %v1120_v44 = vadd.f32 %v1119_v41, %v951_v39  ;;  %v1042_v45 = vpop.f32.mrf.mxu1 }
 0x120   :  { %v1712_v46 = vpop.eup %1711  ;;  %1290 = vst [vmem:[#allocation2 + $0x110] sm:$0xff] %v1710_v43  ;;  %v1043_v47 = vadd.f32 %v1042_v45, %v874_v42  ;;  %1551 = vmatmul.msk.bf16.gmra.mxu0 %vm1550_vm15, %v1855_v10  ;;  %vm1648_vm15 = vmpackc.low %vm385_vm9, %vm383_vm13  ;;  %v261_v43 = vpop.permute.xlu2 %260 }
 0x121   :  { %1259 = vst [vmem:[#allocation2 + $0x18] sm:$0xff] %v1712_v46  ;;  %1713 = vtanh.f32 %v1120_v44  ;;  %1583 = vmatmul.msk.bf16.gmra.mxu2 %vm1582_vm0, %v1855_v10  ;;  %vm324_vm0 = vcmp.eq.s32.totalorder %v159_v24, %v2065_v2  ;;  %vm393_vm5 = vcmp.eq.s32.totalorder %v261_v43, %v2074_v5 }
 0x122   :  { %1715 = vtanh.f32 %v1043_v47  ;;  %1615 = vmatmul.msk.bf16.gmra.mxu1 %vm1614_vm2, %v1855_v10  ;;  %vm388_vm2 = vcmp.eq.s32.totalorder %v255_v14, %v2065_v2 }
 0x123   :  { %1647 = vmatmul.msk.bf16.gmra.mxu3 %vm1646_vm3, %v1855_v10  ;;  %vm322_vm3 = vcmp.eq.s32.totalorder %v156_v25, %v2065_v2  ;;  %vm1586_vm9 = vmpackc.low %vm388_vm2, %vm386_vm1  ;;  %vm392_vm1 = vcmp.eq.s32.totalorder %v261_v43, %v2065_v2  ;;  %vm391_vm2 = vcmp.eq.s32.totalorder %v258_v32, %v2074_v5 }
 0x124   :  { %v953_v49 = vpop.f32.mrf.mxu2  ;;  %vm1554_vm7 = vmpackc.low %vm324_vm0, %vm322_vm3 }
 0x125   :  { %v954_v51 = vadd.f32 %v2223_v56, %v953_v49  ;;  %v875_v52 = vpop.f32.mrf.mxu0  ;;  %v165_v49 = vpop.permute.xlu1 %164 }
 0x126   :  { %v1122_v53 = vpop.f32.mrf.mxu3  ;;  %v876_v54 = vadd.f32 %v2223_v56, %v875_v52  ;;  %vm328_vm13 = vcmp.eq.s32.totalorder %v165_v49, %v2065_v2  ;;  %vm329_vm0 = vcmp.eq.s32.totalorder %v165_v49, %v2074_v5 }
 0x127   :  { %v1714_v55 = vpop.eup %1713  ;;  %v1123_v57 = vadd.f32 %v1122_v53, %v954_v51  ;;  %v1044_v58 = vpop.f32.mrf.mxu1 }
 0x128   :  { %v1716_v59 = vpop.eup %1715  ;;  %1291 = vst [vmem:[#allocation2 + $0x118] sm:$0xff] %v1714_v55  ;;  %v1045_v60 = vadd.f32 %v1044_v58, %v876_v54  ;;  %v264_v61 = vpop.permute.xlu2 %263 }
 0x129   :  { %1260 = vst [vmem:[#allocation2 + $0x20] sm:$0xff] %v1716_v59  ;;  %1717 = vtanh.f32 %v1123_v57 }
 0x12a   :  { %1719 = vtanh.f32 %v1045_v60 }
 0x12c   :  { %v955_v63 = vpop.f32.mrf.mxu2 }
 0x12d   :  { %v956_v0 = vadd.f32 %v2223_v56, %v955_v63  ;;  %v878_v1 = vpop.f32.mrf.mxu0  ;;  %v267_v63 = vpop.permute.xlu0 %266 }
 0x12e   :  { %v1124_v3 = vpop.f32.mrf.mxu3  ;;  %v879_v4 = vadd.f32 %v2223_v56, %v878_v1 }
 0x12f   :  { %v1718_v6 = vpop.eup %1717  ;;  %v1125_v8 = vadd.f32 %v1124_v3, %v956_v0  ;;  %v1047_v9 = vpop.f32.mrf.mxu1 }
 0x130   :  { %v1720_v11 = vpop.eup %1719  ;;  %1292 = vst [vmem:[#allocation2 + $0x120] sm:$0xff] %v1718_v6  ;;  %v1048_v12 = vadd.f32 %v1047_v9, %v879_v4  ;;  %1553 = vmatmul.msk.bf16.gmra.mxu0 %vm1552_vm10, %v1855_v10  ;;  %vm1618_vm10 = vmpackc.low %vm325_vm4, %vm323_vm8 }
 0x131   :  { %1261 = vst [vmem:[#allocation2 + $0x28] sm:$0xff] %v1720_v11  ;;  %1721 = vtanh.f32 %v1125_v8  ;;  %1585 = vmatmul.msk.bf16.gmra.mxu2 %vm1584_vm12, %v1855_v10  ;;  %vm326_vm12 = vcmp.eq.s32.totalorder %v162_v48, %v2065_v2 }
 0x132   :  { %1723 = vtanh.f32 %v1048_v12  ;;  %1617 = vmatmul.msk.bf16.gmra.mxu1 %vm1616_vm14, %v1855_v10  ;;  %vm390_vm14 = vcmp.eq.s32.totalorder %v258_v32, %v2065_v2  ;;  %vm1556_vm3 = vmpackc.low %vm328_vm13, %vm326_vm12  ;;  %v168_v12 = vpop.permute.xlu1 %167  ;;  %vm394_vm12 = vcmp.eq.s32.totalorder %v264_v61, %v2065_v2  ;;  %vm397_vm13 = vcmp.eq.s32.totalorder %v267_v63, %v2074_v5 }
 0x133   :  { %1649 = vmatmul.msk.bf16.gmra.mxu3 %vm1648_vm15, %v1855_v10  ;;  %vm327_vm15 = vcmp.eq.s32.totalorder %v162_v48, %v2074_v5  ;;  %vm1588_vm4 = vmpackc.low %vm392_vm1, %vm390_vm14  ;;  %vm330_vm8 = vcmp.eq.s32.totalorder %v168_v12, %v2065_v2  ;;  %vm395_vm1 = vcmp.eq.s32.totalorder %v264_v61, %v2074_v5 }
 0x134   :  { %v958_v13 = vpop.f32.mrf.mxu2  ;;  %vm1620_vm6 = vmpackc.low %vm329_vm0, %vm327_vm15 }
 0x135   :  { %v959_v15 = vadd.f32 %v2223_v56, %v958_v13  ;;  %v880_v16 = vpop.f32.mrf.mxu0  ;;  %v171_v13 = vpop.permute.xlu2 %170 }
 0x136   :  { %v1127_v17 = vpop.f32.mrf.mxu3  ;;  %v881_v18 = vadd.f32 %v2223_v56, %v880_v16  ;;  %vm333_vm15 = vcmp.eq.s32.totalorder %v171_v13, %v2074_v5 }
 0x137   :  { %v1722_v19 = vpop.eup %1721  ;;  %v1128_v20 = vadd.f32 %v1127_v17, %v959_v15  ;;  %v1049_v21 = vpop.f32.mrf.mxu1 }
 0x138   :  { %v1724_v22 = vpop.eup %1723  ;;  %1293 = vst [vmem:[#allocation2 + $0x128] sm:$0xff] %v1722_v19  ;;  %v1050_v23 = vadd.f32 %v1049_v21, %v881_v18 }
 0x139   :  { %1262 = vst [vmem:[#allocation2 + $0x30] sm:$0xff] %v1724_v22  ;;  %1725 = vtanh.f32 %v1128_v20  ;;  %v270_v20 = vpop.permute.xlu0 %269 }
 0x13a   :  { %1727 = vtanh.f32 %v1050_v23 }
 0x13c   :  { %v960_v26 = vpop.f32.mrf.mxu2 }
 0x13d   :  { %v961_v27 = vadd.f32 %v2223_v56, %v960_v26  ;;  %v883_v28 = vpop.f32.mrf.mxu0 }
 0x13e   :  { %v1129_v29 = vpop.f32.mrf.mxu3  ;;  %v884_v30 = vadd.f32 %v2223_v56, %v883_v28 }
 0x13f   :  { %v1726_v31 = vpop.eup %1725  ;;  %v1130_v33 = vadd.f32 %v1129_v29, %v961_v27  ;;  %v1052_v34 = vpop.f32.mrf.mxu1 }
 0x140   :  { %v1728_v35 = vpop.eup %1727  ;;  %1294 = vst [vmem:[#allocation2 + $0x130] sm:$0xff] %v1726_v31  ;;  %v1053_v36 = vadd.f32 %v1052_v34, %v884_v30  ;;  %1555 = vmatmul.msk.bf16.gmra.mxu0 %vm1554_vm7, %v1855_v10  ;;  %vm1652_vm7 = vmpackc.low %vm393_vm5, %vm391_vm2  ;;  %vm398_vm5 = vcmp.eq.s32.totalorder %v270_v20, %v2065_v2 }
 0x141   :  { %1263 = vst [vmem:[#allocation2 + $0x38] sm:$0xff] %v1728_v35  ;;  %1729 = vtanh.f32 %v1130_v33  ;;  %1587 = vmatmul.msk.bf16.gmra.mxu2 %vm1586_vm9, %v1855_v10  ;;  %vm396_vm9 = vcmp.eq.s32.totalorder %v267_v63, %v2065_v2  ;;  %v177_v35 = vpop.permute.xlu0 %176 }
 0x142   :  { %1731 = vtanh.f32 %v1053_v36  ;;  %1619 = vmatmul.msk.bf16.gmra.mxu1 %vm1618_vm10, %v1855_v10  ;;  %vm332_vm10 = vcmp.eq.s32.totalorder %v171_v13, %v2065_v2  ;;  %vm1590_vm0 = vmpackc.low %vm396_vm9, %vm394_vm12  ;;  %v273_v36 = vpop.permute.xlu1 %272  ;;  %vm399_vm9 = vcmp.eq.s32.totalorder %v270_v20, %v2074_v5 }
 0x143   :  { %1651 = vmatmul.msk.bf16.gmra.mxu3 %vm1650_vm11, %v1855_v10  ;;  %vm331_vm11 = vcmp.eq.s32.totalorder %v168_v12, %v2074_v5  ;;  %vm1558_vm14 = vmpackc.low %vm332_vm10, %vm330_vm8  ;;  %vm337_vm8 = vcmp.eq.s32.totalorder %v177_v35, %v2074_v5  ;;  %vm401_vm10 = vcmp.eq.s32.totalorder %v273_v36, %v2074_v5 }
 0x144   :  { %v963_v37 = vpop.f32.mrf.mxu2  ;;  %vm1622_vm2 = vmpackc.low %vm333_vm15, %vm331_vm11 }
 0x145   :  { %v964_v38 = vadd.f32 %v2223_v56, %v963_v37  ;;  %v885_v39 = vpop.f32.mrf.mxu0  ;;  %v174_v37 = vpop.permute.xlu2 %173  ;;  %vm1656_vm15 = vmpackc.low %vm401_vm10, %vm399_vm9 }
 0x146   :  { %v1132_v40 = vpop.f32.mrf.mxu3  ;;  %v886_v41 = vadd.f32 %v2223_v56, %v885_v39  ;;  %vm335_vm12 = vcmp.eq.s32.totalorder %v174_v37, %v2074_v5 }
 0x147   :  { %v1730_v42 = vpop.eup %1729  ;;  %v1133_v44 = vadd.f32 %v1132_v40, %v964_v38  ;;  %v1054_v45 = vpop.f32.mrf.mxu1 }
 0x148   :  { %v1732_v46 = vpop.eup %1731  ;;  %1295 = vst [vmem:[#allocation2 + $0x138] sm:$0xff] %v1730_v42  ;;  %v1055_v47 = vadd.f32 %v1054_v45, %v886_v41 }
 0x149   :  { %1264 = vst [vmem:[#allocation2 + $0x40] sm:$0xff] %v1732_v46  ;;  %1733 = vtanh.f32 %v1133_v44 }
 0x14a   :  { %1735 = vtanh.f32 %v1055_v47 }
 0x14c   :  { %v965_v50 = vpop.f32.mrf.mxu2 }
 0x14d   :  { %v966_v51 = vadd.f32 %v2223_v56, %v965_v50  ;;  %v888_v52 = vpop.f32.mrf.mxu0 }
 0x14e   :  { %v1134_v53 = vpop.f32.mrf.mxu3  ;;  %v889_v54 = vadd.f32 %v2223_v56, %v888_v52 }
 0x14f   :  { %v1734_v55 = vpop.eup %1733  ;;  %v1135_v57 = vadd.f32 %v1134_v53, %v966_v51  ;;  %v1057_v58 = vpop.f32.mrf.mxu1 }
 0x150   :  { %v1736_v59 = vpop.eup %1735  ;;  %1296 = vst [vmem:[#allocation2 + $0x140] sm:$0xff] %v1734_v55  ;;  %v1058_v60 = vadd.f32 %v1057_v58, %v889_v54  ;;  %1557 = vmatmul.msk.bf16.gmra.mxu0 %vm1556_vm3, %v1855_v10  ;;  %vm1654_vm3 = vmpackc.low %vm397_vm13, %vm395_vm1 }
 0x151   :  { %1265 = vst [vmem:[#allocation2 + $0x48] sm:$0xff] %v1736_v59  ;;  %1737 = vtanh.f32 %v1135_v57  ;;  %1589 = vmatmul.msk.bf16.gmra.mxu2 %vm1588_vm4, %v1855_v10  ;;  %vm336_vm4 = vcmp.eq.s32.totalorder %v177_v35, %v2065_v2 }
 0x152   :  { %1739 = vtanh.f32 %v1058_v60  ;;  %1621 = vmatmul.msk.bf16.gmra.mxu1 %vm1620_vm6, %v1855_v10  ;;  %vm400_vm6 = vcmp.eq.s32.totalorder %v273_v36, %v2065_v2 }
 0x153   :  { %1653 = vmatmul.msk.bf16.gmra.mxu3 %vm1652_vm7, %v1855_v10  ;;  %vm334_vm7 = vcmp.eq.s32.totalorder %v174_v37, %v2065_v2  ;;  %vm1592_vm13 = vmpackc.low %vm400_vm6, %vm398_vm5 }
 0x154   :  { %v968_v62 = vpop.f32.mrf.mxu2  ;;  %vm1560_vm11 = vmpackc.low %vm336_vm4, %vm334_vm7 }
 0x155   :  { %v969_v0 = vadd.f32 %v2223_v56, %v968_v62  ;;  %v890_v1 = vpop.f32.mrf.mxu0 }
 0x156   :  { %v1137_v3 = vpop.f32.mrf.mxu3  ;;  %v891_v4 = vadd.f32 %v2223_v56, %v890_v1 }
 0x157   :  { %v1738_v6 = vpop.eup %1737  ;;  %v1138_v7 = vadd.f32 %v1137_v3, %v969_v0  ;;  %v1059_v8 = vpop.f32.mrf.mxu1 }
 0x158   :  { %v1740_v9 = vpop.eup %1739  ;;  %1297 = vst [vmem:[#allocation2 + $0x148] sm:$0xff] %v1738_v6  ;;  %v1060_v11 = vadd.f32 %v1059_v8, %v891_v4 }
 0x159   :  { %1266 = vst [vmem:[#allocation2 + $0x50] sm:$0xff] %v1740_v9  ;;  %1741 = vtanh.f32 %v1138_v7 }
 0x15a   :  { %1743 = vtanh.f32 %v1060_v11 }
 0x15c   :  { %v970_v14 = vpop.f32.mrf.mxu2 }
 0x15d   :  { %v971_v15 = vadd.f32 %v2223_v56, %v970_v14  ;;  %v893_v16 = vpop.f32.mrf.mxu0 }
 0x15e   :  { %v1139_v17 = vpop.f32.mrf.mxu3  ;;  %v894_v18 = vadd.f32 %v2223_v56, %v893_v16 }
 0x15f   :  { %v1742_v19 = vpop.eup %1741  ;;  %v1140_v21 = vadd.f32 %v1139_v17, %v971_v15  ;;  %v1062_v22 = vpop.f32.mrf.mxu1 }
 0x160   :  { %v1744_v23 = vpop.eup %1743  ;;  %1298 = vst [vmem:[#allocation2 + $0x150] sm:$0xff] %v1742_v19  ;;  %v1063_v24 = vadd.f32 %v1062_v22, %v894_v18  ;;  %1559 = vmatmul.msk.bf16.gmra.mxu0 %vm1558_vm14, %v1855_v10  ;;  %vm1624_vm14 = vmpackc.low %vm337_vm8, %vm335_vm12 }
 0x161   :  { %1267 = vst [vmem:[#allocation2 + $0x58] sm:$0xff] %v1744_v23  ;;  %1745 = vtanh.f32 %v1140_v21  ;;  %1591 = vmatmul.msk.bf16.gmra.mxu2 %vm1590_vm0, %v1855_v10 }
 0x162   :  { %1747 = vtanh.f32 %v1063_v24  ;;  %1623 = vmatmul.msk.bf16.gmra.mxu1 %vm1622_vm2, %v1855_v10 }
 0x163   :  { %1655 = vmatmul.msk.bf16.gmra.mxu3 %vm1654_vm3, %v1855_v10 }
 0x164   :  { %v973_v25 = vpop.f32.mrf.mxu2 }
 0x165   :  { %v974_v26 = vadd.f32 %v2223_v56, %v973_v25  ;;  %v895_v27 = vpop.f32.mrf.mxu0 }
 0x166   :  { %v1142_v28 = vpop.f32.mrf.mxu3  ;;  %v896_v29 = vadd.f32 %v2223_v56, %v895_v27 }
 0x167   :  { %v1746_v30 = vpop.eup %1745  ;;  %v1143_v31 = vadd.f32 %v1142_v28, %v974_v26  ;;  %v1064_v32 = vpop.f32.mrf.mxu1 }
 0x168   :  { %v1748_v33 = vpop.eup %1747  ;;  %1299 = vst [vmem:[#allocation2 + $0x158] sm:$0xff] %v1746_v30  ;;  %v1065_v34 = vadd.f32 %v1064_v32, %v896_v29 }
 0x169   :  { %1268 = vst [vmem:[#allocation2 + $0x60] sm:$0xff] %v1748_v33  ;;  %1749 = vtanh.f32 %v1143_v31 }
 0x16a   :  { %1751 = vtanh.f32 %v1065_v34 }
 0x16c   :  { %v975_v38 = vpop.f32.mrf.mxu2 }
 0x16d   :  { %v976_v39 = vadd.f32 %v2223_v56, %v975_v38  ;;  %v898_v40 = vpop.f32.mrf.mxu0 }
 0x16e   :  { %v1144_v41 = vpop.f32.mrf.mxu3  ;;  %v899_v42 = vadd.f32 %v2223_v56, %v898_v40 }
 0x16f   :  { %v1750_v43 = vpop.eup %1749  ;;  %v1145_v44 = vadd.f32 %v1144_v41, %v976_v39  ;;  %v1067_v45 = vpop.f32.mrf.mxu1 }
 0x170   :  { %v1752_v46 = vpop.eup %1751  ;;  %1300 = vst [vmem:[#allocation2 + $0x160] sm:$0xff] %v1750_v43  ;;  %v1068_v47 = vadd.f32 %v1067_v45, %v899_v42  ;;  %1561 = vmatmul.msk.bf16.gmra.mxu0 %vm1560_vm11, %v1855_v10 }
 0x171   :  { %1269 = vst [vmem:[#allocation2 + $0x68] sm:$0xff] %v1752_v46  ;;  %1753 = vtanh.f32 %v1145_v44  ;;  %1593 = vmatmul.msk.bf16.gmra.mxu2 %vm1592_vm13, %v1855_v10 }
 0x172   :  { %1755 = vtanh.f32 %v1068_v47  ;;  %1625 = vmatmul.msk.bf16.gmra.mxu1 %vm1624_vm14, %v1855_v10 }
 0x173   :  { %1657 = vmatmul.msk.bf16.gmra.mxu3 %vm1656_vm15, %v1855_v10 }
 0x174   :  { %v978_v2 = vpop.f32.mrf.mxu2 }
 0x175   :  { %v979_v48 = vadd.f32 %v2223_v56, %v978_v2  ;;  %v900_v49 = vpop.f32.mrf.mxu0 }
 0x176   :  { %v1147_v50 = vpop.f32.mrf.mxu3  ;;  %v901_v51 = vadd.f32 %v2223_v56, %v900_v49 }
 0x177   :  { %v1754_v52 = vpop.eup %1753  ;;  %v1148_v53 = vadd.f32 %v1147_v50, %v979_v48  ;;  %v1069_v54 = vpop.f32.mrf.mxu1 }
 0x178   :  { %v1756_v55 = vpop.eup %1755  ;;  %1301 = vst [vmem:[#allocation2 + $0x168] sm:$0xff] %v1754_v52  ;;  %v1070_v57 = vadd.f32 %v1069_v54, %v901_v51 }
 0x179   :  { %1270 = vst [vmem:[#allocation2 + $0x70] sm:$0xff] %v1756_v55  ;;  %1757 = vtanh.f32 %v1148_v53 }
 0x17a   :  { %1759 = vtanh.f32 %v1070_v57 }
 0x17c   :  { %v980_v5 = vpop.f32.mrf.mxu2 }
 0x17d   :  { %v981_v58 = vadd.f32 %v2223_v56, %v980_v5  ;;  %v903_v10 = vpop.f32.mrf.mxu0 }
 0x17e   :  { %v1149_v59 = vpop.f32.mrf.mxu3  ;;  %v904_v60 = vadd.f32 %v2223_v56, %v903_v10 }
 0x17f   :  { %v1758_v61 = vpop.eup %1757  ;;  %v1150_v62 = vadd.f32 %v1149_v59, %v981_v58  ;;  %v1072_v63 = vpop.f32.mrf.mxu1 }
 0x180   :  { %v1760_v0 = vpop.eup %1759  ;;  %1302 = vst [vmem:[#allocation2 + $0x170] sm:$0xff] %v1758_v61  ;;  %v1073_v1 = vadd.f32 %v1072_v63, %v904_v60 }
 0x181   :  { %1271 = vst [vmem:[#allocation2 + $0x78] sm:$0xff] %v1760_v0  ;;  %1761 = vtanh.f32 %v1150_v62 }
 0x182   :  { %1763 = vtanh.f32 %v1073_v1 }
 0x184   :  { %v983_v3 = vpop.f32.mrf.mxu2 }
 0x185   :  { %v984_v4 = vadd.f32 %v2223_v56, %v983_v3  ;;  %v905_v6 = vpop.f32.mrf.mxu0 }
 0x186   :  { %v1152_v7 = vpop.f32.mrf.mxu3  ;;  %v906_v8 = vadd.f32 %v2223_v56, %v905_v6 }
 0x187   :  { %v1762_v9 = vpop.eup %1761  ;;  %v1153_v11 = vadd.f32 %v1152_v7, %v984_v4  ;;  %v1074_v12 = vpop.f32.mrf.mxu1 }
 0x188   :  { %v1764_v13 = vpop.eup %1763  ;;  %1303 = vst [vmem:[#allocation2 + $0x178] sm:$0xff] %v1762_v9  ;;  %v1075_v14 = vadd.f32 %v1074_v12, %v906_v8 }
 0x189   :  { %1272 = vst [vmem:[#allocation2 + $0x80] sm:$0xff] %v1764_v13  ;;  %1765 = vtanh.f32 %v1153_v11 }
 0x18a   :  { %1767 = vtanh.f32 %v1075_v14 }
 0x18c   :  { %v985_v15 = vpop.f32.mrf.mxu2 }
 0x18d   :  { %v986_v16 = vadd.f32 %v2223_v56, %v985_v15  ;;  %v908_v17 = vpop.f32.mrf.mxu0 }
 0x18e   :  { %v1154_v18 = vpop.f32.mrf.mxu3  ;;  %v909_v19 = vadd.f32 %v2223_v56, %v908_v17 }
 0x18f   :  { %v1766_v20 = vpop.eup %1765  ;;  %v1155_v21 = vadd.f32 %v1154_v18, %v986_v16  ;;  %v1077_v22 = vpop.f32.mrf.mxu1 }
 0x190   :  { %v1768_v23 = vpop.eup %1767  ;;  %1304 = vst [vmem:[#allocation2 + $0x180] sm:$0xff] %v1766_v20  ;;  %v1078_v24 = vadd.f32 %v1077_v22, %v909_v19 }
 0x191   :  { %1273 = vst [vmem:[#allocation2 + $0x88] sm:$0xff] %v1768_v23  ;;  %1769 = vtanh.f32 %v1155_v21 }
 0x192   :  { %1771 = vtanh.f32 %v1078_v24 }
 0x194   :  { %v988_v25 = vpop.f32.mrf.mxu2 }
 0x195   :  { %v989_v26 = vadd.f32 %v2223_v56, %v988_v25  ;;  %v910_v27 = vpop.f32.mrf.mxu0 }
 0x196   :  { %v1157_v28 = vpop.f32.mrf.mxu3  ;;  %v911_v29 = vadd.f32 %v2223_v56, %v910_v27 }
 0x197   :  { %v1770_v30 = vpop.eup %1769  ;;  %v1158_v31 = vadd.f32 %v1157_v28, %v989_v26  ;;  %v1079_v32 = vpop.f32.mrf.mxu1 }
 0x198   :  { %v1772_v33 = vpop.eup %1771  ;;  %1305 = vst [vmem:[#allocation2 + $0x188] sm:$0xff] %v1770_v30  ;;  %v1080_v34 = vadd.f32 %v1079_v32, %v911_v29 }
 0x199   :  { %1274 = vst [vmem:[#allocation2 + $0x90] sm:$0xff] %v1772_v33  ;;  %1773 = vtanh.f32 %v1158_v31  ;;  %v2447_v33 = vld [vmem:[%s2467_s2] ss:$0 sm:$0xff]  ;;  %s1856_s2 = smov [#allocation2]  }
 0x19a   :  { %1775 = vtanh.f32 %v1080_v34  ;;  %s1324_s11 = sshll.u32 %s1856_s2, 4  ;;  %s1325_s11 = int_to_ptr.vmem [resolvable:$true] %s1324_s11 }
 0x19c   :  { %v990_v35 = vpop.f32.mrf.mxu2 }
 0x19d   :  { %v991_v36 = vadd.f32 %v2223_v56, %v990_v35  ;;  %v913_v37 = vpop.f32.mrf.mxu0 }
 0x19e   :  { %v1159_v38 = vpop.f32.mrf.mxu3  ;;  %v914_v39 = vadd.f32 %v2223_v56, %v913_v37 }
 0x19f   :  { %v1774_v40 = vpop.eup %1773  ;;  %v1160_v41 = vadd.f32 %v1159_v38, %v991_v36  ;;  %v1082_v42 = vpop.f32.mrf.mxu1 }
 0x1a0   :  { %v1776_v43 = vpop.eup %1775  ;;  %1306 = vst [vmem:[#allocation2 + $0x190] sm:$0xff] %v1774_v40  ;;  %v1083_v44 = vadd.f32 %v1082_v42, %v914_v39 }
 0x1a1   :  { %1275 = vst [vmem:[#allocation2 + $0x98] sm:$0xff] %v1776_v43  ;;  %1777 = vtanh.f32 %v1160_v41 }
 0x1a2   :  { %1779 = vtanh.f32 %v1083_v44 }
 0x1a4   :  { %v993_v45 = vpop.f32.mrf.mxu2 }
 0x1a5   :  { %v994_v46 = vadd.f32 %v2223_v56, %v993_v45  ;;  %v915_v47 = vpop.f32.mrf.mxu0 }
 0x1a6   :  { %v1162_v2 = vpop.f32.mrf.mxu3  ;;  %v916_v48 = vadd.f32 %v2223_v56, %v915_v47 }
 0x1a7   :  { %v1778_v49 = vpop.eup %1777  ;;  %v1163_v50 = vadd.f32 %v1162_v2, %v994_v46  ;;  %v1084_v51 = vpop.f32.mrf.mxu1 }
 0x1a8   :  { %v1780_v52 = vpop.eup %1779  ;;  %1307 = vst [vmem:[#allocation2 + $0x198] sm:$0xff] %v1778_v49  ;;  %v1085_v53 = vadd.f32 %v1084_v51, %v916_v48 }
 0x1a9   :  { %1276 = vst [vmem:[#allocation2 + $0xa0] sm:$0xff] %v1780_v52  ;;  %1781 = vtanh.f32 %v1163_v50 }
 0x1aa   :  { %1783 = vtanh.f32 %v1085_v53 }
 0x1ac   :  { %v995_v54 = vpop.f32.mrf.mxu2 }
 0x1ad   :  { %v996_v55 = vadd.f32 %v2223_v56, %v995_v54  ;;  %v918_v57 = vpop.f32.mrf.mxu0 }
 0x1ae   :  { %v1164_v5 = vpop.f32.mrf.mxu3  ;;  %v919_v58 = vadd.f32 %v2223_v56, %v918_v57 }
 0x1af   :  { %v1782_v10 = vpop.eup %1781  ;;  %v1165_v59 = vadd.f32 %v1164_v5, %v996_v55  ;;  %v1087_v60 = vpop.f32.mrf.mxu1 }
 0x1b0   :  { %v1784_v61 = vpop.eup %1783  ;;  %1308 = vst [vmem:[#allocation2 + $0x1a0] sm:$0xff] %v1782_v10  ;;  %v1088_v62 = vadd.f32 %v1087_v60, %v919_v58 }
 0x1b1   :  { %1277 = vst [vmem:[#allocation2 + $0xa8] sm:$0xff] %v1784_v61  ;;  %1785 = vtanh.f32 %v1165_v59 }
 0x1b2   :  { %1787 = vtanh.f32 %v1088_v62 }
 0x1b4   :  { %v998_v63 = vpop.f32.mrf.mxu2 }
 0x1b5   :  { %v999_v0 = vadd.f32 %v2223_v56, %v998_v63  ;;  %v920_v1 = vpop.f32.mrf.mxu0 }
 0x1b6   :  { %v1167_v3 = vpop.f32.mrf.mxu3  ;;  %v921_v4 = vadd.f32 %v2223_v56, %v920_v1 }
 0x1b7   :  { %v1786_v6 = vpop.eup %1785  ;;  %v1168_v7 = vadd.f32 %v1167_v3, %v999_v0  ;;  %v1089_v8 = vpop.f32.mrf.mxu1 }
 0x1b8   :  { %v1788_v9 = vpop.eup %1787  ;;  %1309 = vst [vmem:[#allocation2 + $0x1a8] sm:$0xff] %v1786_v6  ;;  %v1090_v11 = vadd.f32 %v1089_v8, %v921_v4 }
 0x1b9   :  { %1278 = vst [vmem:[#allocation2 + $0xb0] sm:$0xff] %v1788_v9  ;;  %1789 = vtanh.f32 %v1168_v7 }
 0x1ba   :  { %1791 = vtanh.f32 %v1090_v11 }
 0x1bc   :  { %v1000_v12 = vpop.f32.mrf.mxu2 }
 0x1bd   :  { %v1001_v13 = vadd.f32 %v2223_v56, %v1000_v12  ;;  %v923_v14 = vpop.f32.mrf.mxu0 }
 0x1be   :  { %v1169_v15 = vpop.f32.mrf.mxu3  ;;  %v924_v16 = vadd.f32 %v2223_v56, %v923_v14 }
 0x1bf   :  { %v1790_v17 = vpop.eup %1789  ;;  %v1170_v18 = vadd.f32 %v1169_v15, %v1001_v13  ;;  %v1092_v19 = vpop.f32.mrf.mxu1 }
 0x1c0   :  { %v1792_v20 = vpop.eup %1791  ;;  %1310 = vst [vmem:[#allocation2 + $0x1b0] sm:$0xff] %v1790_v17  ;;  %v1093_v21 = vadd.f32 %v1092_v19, %v924_v16 }
 0x1c1   :  { %1279 = vst [vmem:[#allocation2 + $0xb8] sm:$0xff] %v1792_v20  ;;  %1793 = vtanh.f32 %v1170_v18 }
 0x1c2   :  { %1795 = vtanh.f32 %v1093_v21 }
 0x1c4   :  { %v1003_v22 = vpop.f32.mrf.mxu2 }
 0x1c5   :  { %v1004_v23 = vadd.f32 %v2223_v56, %v1003_v22  ;;  %v925_v24 = vpop.f32.mrf.mxu0 }
 0x1c6   :  { %v1172_v25 = vpop.f32.mrf.mxu3  ;;  %v926_v26 = vadd.f32 %v2223_v56, %v925_v24 }
 0x1c7   :  { %v1794_v27 = vpop.eup %1793  ;;  %v1173_v28 = vadd.f32 %v1172_v25, %v1004_v23  ;;  %v1094_v29 = vpop.f32.mrf.mxu1 }
 0x1c8   :  { %v1796_v30 = vpop.eup %1795  ;;  %1311 = vst [vmem:[#allocation2 + $0x1b8] sm:$0xff] %v1794_v27  ;;  %v1095_v31 = vadd.f32 %v1094_v29, %v926_v26 }
 0x1c9   :  { %1280 = vst [vmem:[#allocation2 + $0xc0] sm:$0xff] %v1796_v30  ;;  %1797 = vtanh.f32 %v1173_v28 }
 0x1ca   :  { %1799 = vtanh.f32 %v1095_v31 }
 0x1cc   :  { %v1005_v32 = vpop.f32.mrf.mxu2 }
 0x1cd   :  { %v1006_v34 = vadd.f32 %v2447_v33, %v1005_v32  ;;  %v928_v35 = vpop.f32.mrf.mxu0 }
 0x1ce   :  { %v1174_v36 = vpop.f32.mrf.mxu3  ;;  %v929_v56 = vadd.f32 %v2447_v33, %v928_v35 }
 0x1cf   :  { %v1798_v37 = vpop.eup %1797  ;;  %v1175_v38 = vadd.f32 %v1174_v36, %v1006_v34  ;;  %v1097_v39 = vpop.f32.mrf.mxu1 }
 0x1d0   :  { %v1800_v40 = vpop.eup %1799  ;;  %1312 = vst [vmem:[#allocation2 + $0x1c0] sm:$0xff] %v1798_v37  ;;  %v1098_v41 = vadd.f32 %v1097_v39, %v929_v56 }
 0x1d1   :  { %1281 = vst [vmem:[#allocation2 + $0xc8] sm:$0xff] %v1800_v40  ;;  %1801 = vtanh.f32 %v1175_v38 }
 0x1d2   :  { %1803 = vtanh.f32 %v1098_v41 }
 0x1d4   :  { %v1008_v42 = vpop.f32.mrf.mxu2 }
 0x1d5   :  { %v1009_v43 = vadd.f32 %v2447_v33, %v1008_v42  ;;  %v930_v44 = vpop.f32.mrf.mxu0 }
 0x1d6   :  { %v1177_v45 = vpop.f32.mrf.mxu3  ;;  %v931_v46 = vadd.f32 %v2447_v33, %v930_v44 }
 0x1d7   :  { %v1802_v47 = vpop.eup %1801  ;;  %v1178_v2 = vadd.f32 %v1177_v45, %v1009_v43  ;;  %v1099_v48 = vpop.f32.mrf.mxu1 }
 0x1d8   :  { %v1804_v49 = vpop.eup %1803  ;;  %1313 = vst [vmem:[#allocation2 + $0x1c8] sm:$0xff] %v1802_v47  ;;  %v1100_v50 = vadd.f32 %v1099_v48, %v931_v46 }
 0x1d9   :  { %1282 = vst [vmem:[#allocation2 + $0xd0] sm:$0xff] %v1804_v49  ;;  %1805 = vtanh.f32 %v1178_v2 }
 0x1da   :  { %1807 = vtanh.f32 %v1100_v50 }
 0x1dc   :  { %v1010_v51 = vpop.f32.mrf.mxu2 }
 0x1dd   :  { %v1011_v52 = vadd.f32 %v2447_v33, %v1010_v51  ;;  %v933_v53 = vpop.f32.mrf.mxu0 }
 0x1de   :  { %v1179_v54 = vpop.f32.mrf.mxu3  ;;  %v934_v55 = vadd.f32 %v2447_v33, %v933_v53 }
 0x1df   :  { %v1806_v57 = vpop.eup %1805  ;;  %v1180_v5 = vadd.f32 %v1179_v54, %v1011_v52  ;;  %v1102_v58 = vpop.f32.mrf.mxu1 }
 0x1e0   :  { %v1808_v10 = vpop.eup %1807  ;;  %1314 = vst [vmem:[#allocation2 + $0x1d0] sm:$0xff] %v1806_v57  ;;  %v1103_v59 = vadd.f32 %v1102_v58, %v934_v55 }
 0x1e1   :  { %1283 = vst [vmem:[#allocation2 + $0xd8] sm:$0xff] %v1808_v10  ;;  %1809 = vtanh.f32 %v1180_v5 }
 0x1e2   :  { %1811 = vtanh.f32 %v1103_v59 }
 0x1e4   :  { %v1013_v60 = vpop.f32.mrf.mxu2 }
 0x1e5   :  { %v1014_v61 = vadd.f32 %v2447_v33, %v1013_v60  ;;  %v935_v62 = vpop.f32.mrf.mxu0 }
 0x1e6   :  { %v1182_v63 = vpop.f32.mrf.mxu3  ;;  %v936_v0 = vadd.f32 %v2447_v33, %v935_v62 }
 0x1e7   :  { %v1810_v1 = vpop.eup %1809  ;;  %v1183_v3 = vadd.f32 %v1182_v63, %v1014_v61  ;;  %v1104_v4 = vpop.f32.mrf.mxu1 }
 0x1e8   :  { %v1812_v6 = vpop.eup %1811  ;;  %1315 = vst [vmem:[#allocation2 + $0x1d8] sm:$0xff] %v1810_v1  ;;  %v1105_v7 = vadd.f32 %v1104_v4, %v936_v0 }
 0x1e9   :  { %1284 = vst [vmem:[#allocation2 + $0xe0] sm:$0xff] %v1812_v6  ;;  %1813 = vtanh.f32 %v1183_v3 }
 0x1ea   :  { %1815 = vtanh.f32 %v1105_v7 }
 0x1ec   :  { %v1015_v8 = vpop.f32.mrf.mxu2 }
 0x1ed   :  { %v1016_v9 = vadd.f32 %v2447_v33, %v1015_v8  ;;  %v938_v11 = vpop.f32.mrf.mxu0 }
 0x1ee   :  { %v1184_v12 = vpop.f32.mrf.mxu3  ;;  %v939_v13 = vadd.f32 %v2447_v33, %v938_v11 }
 0x1ef   :  { %v1814_v14 = vpop.eup %1813  ;;  %v1185_v15 = vadd.f32 %v1184_v12, %v1016_v9  ;;  %v1107_v16 = vpop.f32.mrf.mxu1 }
 0x1f0   :  { %v1816_v17 = vpop.eup %1815  ;;  %1316 = vst [vmem:[#allocation2 + $0x1e0] sm:$0xff] %v1814_v14  ;;  %v1108_v18 = vadd.f32 %v1107_v16, %v939_v13 }
 0x1f1   :  { %1285 = vst [vmem:[#allocation2 + $0xe8] sm:$0xff] %v1816_v17  ;;  %1817 = vtanh.f32 %v1185_v15 }
 0x1f2   :  { %1819 = vtanh.f32 %v1108_v18 }
 0x1f4   :  { %v1018_v19 = vpop.f32.mrf.mxu2 }
 0x1f5   :  { %v1019_v20 = vadd.f32 %v2447_v33, %v1018_v19  ;;  %v940_v21 = vpop.f32.mrf.mxu0 }
 0x1f6   :  { %v1187_v22 = vpop.f32.mrf.mxu3  ;;  %v941_v23 = vadd.f32 %v2447_v33, %v940_v21 }
 0x1f7   :  { %v1818_v24 = vpop.eup %1817  ;;  %v1188_v25 = vadd.f32 %v1187_v22, %v1019_v20  ;;  %v1109_v26 = vpop.f32.mrf.mxu1 }
 0x1f8   :  { %v1820_v27 = vpop.eup %1819  ;;  %1317 = vst [vmem:[#allocation2 + $0x1e8] sm:$0xff] %v1818_v24  ;;  %v1110_v28 = vadd.f32 %v1109_v26, %v941_v23 }
 0x1f9   :  { %1286 = vst [vmem:[#allocation2 + $0xf0] sm:$0xff] %v1820_v27  ;;  %1821 = vtanh.f32 %v1188_v25 }
 0x1fa   :  { %1823 = vtanh.f32 %v1110_v28 }
 0x1fc   :  { %v1020_v29 = vpop.f32.mrf.mxu2 }
 0x1fd   :  { %v1021_v30 = vadd.f32 %v2447_v33, %v1020_v29 }
 0x1fe   :  { %v1189_v31 = vpop.f32.mrf.mxu3 }
 0x1ff   :  { %v1822_v32 = vpop.eup %1821  ;;  %v1190_v34 = vadd.f32 %v1189_v31, %v1021_v30 }
 0x200   :  { %v1824_v35 = vpop.eup %1823  ;;  %1318 = vst [vmem:[#allocation2 + $0x1f0] sm:$0xff] %v1822_v32 }
 0x201   :  { %1287 = vst [vmem:[#allocation2 + $0xf8] sm:$0xff] %v1824_v35  ;;  %1825 = vtanh.f32 %v1190_v34 }
 0x207   :  { %v1826_v36 = vpop.eup %1825 }
 0x208   :  { %1319 = vst [vmem:[#allocation2 + $0x1f8] sm:$0xff] %v1826_v36 }
 0x209   :  { %1332 = dma.vmem_to_hbm [thread:$0]  %s1325_s11, 8192, %s1327_s1, [#allocation3], %s1857_s14, %s1857_s14, %s1858_s15  }
 0x20a   :  { %1852 = dma.done.wait [#allocation3], 8192  }
 0x20b   :  { %1853 = vsyncadd [#allocation3], 4294959104 }
 0x20c   :  { %1337 = vsyncpa [#allocation3], 1 }

</bundles_post_ra>
